<compile_context>
chip_gen: v7x
topology: tpu7x:2x2x1
jax: 0.10.0
libtpu: 0.0.40
codegen_flags: <defaults>
</compile_context>

<pallas_src>
import jax
import jax.numpy as jnp
from jax import lax
from jax.experimental import pallas as pl
from jax.experimental.pallas import tpu as pltpu

# ----- hyperparameters implied by CNN.__init__ (small, synthetic) -----
VOCAB = 20
EMBED = 8              # embedding_size
HIDDEN = 32            # hidden_size
KSIZE = 3              # kernel_size
PAD = 1                # self.padding (hard-coded in the module)
INTERACTION = "concat"
H2 = HIDDEN // 2       # conv2 out channels == MaxPool1d kernel size
H4 = HIDDEN // 4       # inner layer out features
K2 = 1 if KSIZE <= 2 else KSIZE - 2
BATCH = 2
SEQ = 16
NUM_CLASSES = 3
NSEQ = 2 * BATCH       # both branches (x1 rows then x2 rows) encoded together


def calc_conv_dim1(seq_len, k):
    return seq_len + (PAD * 2 - (k - 1))


L1 = calc_conv_dim1(SEQ, KSIZE)    # conv1 output length (= conv2 "core" length) = 16
L2 = calc_conv_dim1(L1, K2)        # conv2 output length = 18
INNER_IN = 2 * L2 if INTERACTION == "concat" else L2

assert K2 == 1 and PAD == 1 and INTERACTION == "concat"
# TODO(synk): dropout is identity (inference) and conv2/edge folding is specialized to
# K2 == 1 and the single configured seq_len; generalize if the module config changes.

# ----- kernel-side geometry -----
ROWS = NSEQ * L1                   # 64 activation rows (sequence-major)
VPAD = 32                          # vocab padded to a power of two per conv1 tap
NGROUP = 4                         # conv1 taps padded 3 -> 4  => contraction = 128 lanes
CDIM = NGROUP * VPAD               # 128
BH4 = BATCH * H4                   # 16
BNC = BATCH * NUM_CLASSES          # 6
SLAB_LANES = 128


def _r8(n):
    return ((n + 7) // 8) * 8


# row offsets inside the single packed parameter slab (all 8-aligned, lane offset always 0)
R_W1 = 0                               # (CDIM, HIDDEN)   embedding (x) conv1, padded
R_W2 = R_W1 + CDIM                     # (HIDDEN, H2)     conv2 (k=1)
R_WI = R_W2 + _r8(HIDDEN)              # (BH4, ROWS)      block interaction + inner weight
R_WC = R_WI + _r8(BH4)                 # (BNC, BH4)       block-diagonal classifier
R_B1 = R_WC + _r8(BNC)                 # (1, HIDDEN)
R_B2 = R_B1 + 8                        # (1, H2)
R_BI = R_B2 + 8                        # (BH4, 1)         inner bias (+ conv2 boundary fold)
R_BC = R_BI + _r8(BH4)                 # (BNC, 1)
SLAB_ROWS = R_BC + _r8(BNC)            # 224


# ----------------------------- Pallas kernel -----------------------------
def cnn_kernel(tok_ref, slab_ref, out_ref):
    # tok_ref : (ROWS, KSIZE) int32 im2col'd token ids (-1 = conv1 zero padding)
    # slab_ref: (SLAB_ROWS, 128) f32 packed parameters (single DMA)
    # out_ref : (BNC, 1) f32 softmax probabilities, row index = b*NUM_CLASSES + c

    # --- one-hot from token ids (pure VPU), all 4 sequences batched ---
    tok = tok_ref[...]
    lane = lax.broadcasted_iota(jnp.int32, (ROWS, CDIM), 1)
    v = jnp.bitwise_and(lane, VPAD - 1)
    sel = jnp.where(lane < VPAD, tok[:, 0:1],
          jnp.where(lane < 2 * VPAD, tok[:, 1:2],
          jnp.where(lane < 3 * VPAD, tok[:, 2:3], -1)))
    oneh = (sel == v).astype(jnp.float32)                           # (ROWS, CDIM)

    # --- embedding + conv1 (+ReLU): one MXU matmul against the folded, padded table ---
    h1 = jnp.maximum(
        jnp.dot(oneh, slab_ref[R_W1:R_W1 + CDIM, 0:HIDDEN],
                preferred_element_type=jnp.float32)
        + slab_ref[R_B1:R_B1 + 1, 0:HIDDEN], 0.0)                   # (ROWS, HIDDEN)

    # --- conv2 (k=1) interior rows (+ReLU); boundary rows are folded into the inner bias ---
    h2 = jnp.maximum(
        jnp.dot(h1, slab_ref[R_W2:R_W2 + HIDDEN, 0:H2],
                preferred_element_type=jnp.float32)
        + slab_ref[R_B2:R_B2 + 1, 0:H2], 0.0)                       # (ROWS, H2)

    # --- MaxPool1d(H2) == max over channels -> (ROWS, 1) column (no transpose) ---
    pooled = jnp.max(h2, axis=-1, keepdims=True)

    # --- 'concat' interaction + inner Linear (+ReLU): ONE matvec against a block weight;
    #     the (sequence, position) regrouping lives in the weight, not in a relayout. ---
    inner = (jnp.dot(slab_ref[R_WI:R_WI + BH4, 0:ROWS], pooled,
                     preferred_element_type=jnp.float32)
             + slab_ref[R_BI:R_BI + BH4, 0:1])                      # (BH4, 1)
    l1c = jnp.maximum(inner, 0.0)

    # --- classifier: block-diagonal matvec -> (BNC, 1) logits column ---
    lg = (jnp.dot(slab_ref[R_WC:R_WC + BNC, 0:BH4], l1c,
                  preferred_element_type=jnp.float32)
          + slab_ref[R_BC:R_BC + BNC, 0:1])

    # --- per-batch softmax on the column via masked reductions (no slicing / relayout) ---
    rowi = lax.broadcasted_iota(jnp.int32, (BNC, 1), 0)
    g0 = rowi < NUM_CLASSES
    neg = jnp.float32(-1e30)
    m0 = jnp.max(jnp.where(g0, lg, neg), axis=0, keepdims=True)
    m1 = jnp.max(jnp.where(g0, neg, lg), axis=0, keepdims=True)
    e = jnp.exp(lg - jnp.where(g0, m0, m1))
    s0 = jnp.sum(jnp.where(g0, e, 0.0), axis=0, keepdims=True)
    s1 = jnp.sum(jnp.where(g0, 0.0, e), axis=0, keepdims=True)
    out_ref[...] = e / jnp.where(g0, s0, s1)


# ------------------ one-time parameter folding / packing ------------------
def prepare_params(params):
    """Fold and pack every parameter into a single (SLAB_ROWS, 128) f32 slab (one DMA)."""
    emb, w1, b1, w2, b2, wi, bi, wc, bc = params

    # embedding (x) conv1 folded into a one-hot contraction table, padded to (CDIM, HIDDEN)
    w1f = jnp.einsum("ve,keh->kvh", emb, w1)                              # (K, V, HIDDEN)
    w1f = jnp.pad(w1f, ((0, NGROUP - KSIZE), (0, VPAD - VOCAB), (0, 0)))
    w1f = w1f.reshape(CDIM, HIDDEN)
    w2r = w2.reshape(HIDDEN, H2)                                          # K2 == 1

    # conv2 boundary rows (zero-padded input) pool to max(relu(b2)); fold into inner bias
    edge = jnp.max(jnp.maximum(b2, 0.0))
    w_edge = wi[0] + wi[L2 - 1] + wi[L2] + wi[2 * L2 - 1]                 # (H4,)
    bi_eff = bi.reshape(H4) + edge * w_edge

    # block-structured interaction + inner weight: inner[b*H4+h] = sum_r wi_t[., r]*pooled[r]
    wi1 = wi[1:1 + L1]                         # branch-1 interior rows   (L1, H4)
    wi2 = wi[L2 + 1:L2 + 1 + L1]               # branch-2 interior rows   (L1, H4)
    wi_t = jnp.zeros((BH4, ROWS), jnp.float32)
    for b in range(BATCH):
        wi_t = wi_t.at[b * H4:(b + 1) * H4, b * L1:(b + 1) * L1].set(wi1.T)
        wi_t = wi_t.at[b * H4:(b + 1) * H4,
                       (BATCH + b) * L1:(BATCH + b + 1) * L1].set(wi2.T)
    bi_col = jnp.tile(bi_eff, (BATCH,)).reshape(BH4, 1)

    # block-diagonal classifier: logits[b*NC+c] = sum_h wc[h,c] * l1[b*H4+h]
    wc_t = jnp.zeros((BNC, BH4), jnp.float32)
    for b in range(BATCH):
        wc_t = wc_t.at[b * NUM_CLASSES:(b + 1) * NUM_CLASSES,
                       b * H4:(b + 1) * H4].set(wc.T)
    bc_col = jnp.tile(bc.reshape(NUM_CLASSES), (BATCH,)).reshape(BNC, 1)

    # pack everything into one lane-dense slab
    slab = jnp.zeros((SLAB_ROWS, SLAB_LANES), jnp.float32)
    slab = slab.at[R_W1:R_W1 + CDIM, 0:HIDDEN].set(w1f)
    slab = slab.at[R_W2:R_W2 + HIDDEN, 0:H2].set(w2r)
    slab = slab.at[R_WI:R_WI + BH4, 0:ROWS].set(wi_t)
    slab = slab.at[R_WC:R_WC + BNC, 0:BH4].set(wc_t)
    slab = slab.at[R_B1, 0:HIDDEN].set(b1.reshape(HIDDEN))
    slab = slab.at[R_B2, 0:H2].set(b2.reshape(H2))
    slab = slab.at[R_BI:R_BI + BH4, 0:1].set(bi_col)
    slab = slab.at[R_BC:R_BC + BNC, 0:1].set(bc_col)
    return slab


# ----------------------------- per-call forward ----------------------------
@jax.jit
def cnn_forward(x1, x2, slab):
    # Per-call work: tiny int32 token prep (fuses into one XLA op) + the pallas_call.
    ids = jnp.concatenate([x1, x2], axis=0).astype(jnp.int32)              # (NSEQ, SEQ)
    ids_p = jnp.pad(ids, ((0, 0), (PAD, PAD)), constant_values=-1)         # (NSEQ, SEQ+2P)
    tok = jnp.stack([ids_p[:, k:k + L1] for k in range(KSIZE)], axis=-1)   # (NSEQ, L1, K)
    tok = tok.reshape(ROWS, KSIZE)                                         # (64, 3) < 1 KB

    out = pl.pallas_call(
        cnn_kernel,
        out_shape=jax.ShapeDtypeStruct((BNC, 1), jnp.float32),
        in_specs=[pl.BlockSpec(memory_space=pltpu.MemorySpace.VMEM),
                  pl.BlockSpec(memory_space=pltpu.MemorySpace.VMEM)],
        out_specs=pl.BlockSpec(memory_space=pltpu.MemorySpace.VMEM),
    )(tok, slab)
    return out.reshape(BATCH, NUM_CLASSES)                                 # bitcast reshape


# ---------------------- deterministic parameter init ----------------------
def init_params(key):
    ks = jax.random.split(key, 9)
    emb = jax.random.normal(ks[0], (VOCAB, EMBED), jnp.float32)
    w1 = jax.random.normal(ks[1], (KSIZE, EMBED, HIDDEN), jnp.float32) * 0.1
    b1 = jax.random.normal(ks[2], (1, HIDDEN), jnp.float32) * 0.1
    w2 = jax.random.normal(ks[3], (K2, HIDDEN, H2), jnp.float32) * 0.1
    b2 = jax.random.normal(ks[4], (1, H2), jnp.float32) * 0.1
    wi = jax.random.normal(ks[5], (INNER_IN, H4), jnp.float32) * 0.1
    bi = jax.random.normal(ks[6], (1, H4), jnp.float32) * 0.1
    wc = jax.random.normal(ks[7], (H4, NUM_CLASSES), jnp.float32) * 0.1
    bc = jax.random.normal(ks[8], (1, NUM_CLASSES), jnp.float32) * 0.1
    return (emb, w1, b1, w2, b2, wi, bi, wc, bc)


# ------------------------- pure-JAX reference -----------------------------
def ref_forward(x1, x2, params):
    emb, w1, b1, w2, b2, wi, bi, wc, bc = params
    w1_oik = jnp.transpose(w1, (2, 1, 0))   # (HIDDEN, EMBED, KSIZE)
    w2_oik = jnp.transpose(w2, (2, 1, 0))   # (H2, HIDDEN, K2)

    def encode(tokens):
        e = emb[tokens]                                 # (B, S, E)
        x = jnp.transpose(e, (0, 2, 1))                 # (B, E, S)  == torch NCL
        h = lax.conv_general_dilated(x, w1_oik, (1,), [(PAD, PAD)],
                                     dimension_numbers=("NCH", "OIH", "NCH"))
        h = jnp.maximum(h + b1.reshape(1, HIDDEN, 1), 0.0)
        h = lax.conv_general_dilated(h, w2_oik, (1,), [(PAD, PAD)],
                                     dimension_numbers=("NCH", "OIH", "NCH"))
        h = jnp.maximum(h + b2.reshape(1, H2, 1), 0.0)  # (B, H2, L2)
        h = jnp.transpose(h, (0, 2, 1))                 # (B, L2, H2)
        return jnp.max(h, axis=-1)                      # MaxPool1d(H2) + squeeze

    enc1, enc2 = encode(x1), encode(x2)
    inter = jnp.concatenate([enc1, enc2], axis=1)       # 'concat' interaction
    l1 = jnp.maximum(inter @ wi + bi, 0.0)
    logits = l1 @ wc + bc
    return jax.nn.softmax(logits, axis=-1)


if __name__ == "__main__":
    key = jax.random.PRNGKey(0)
    pkey, k1, k2 = jax.random.split(key, 3)
    params = init_params(pkey)
    slab = jax.block_until_ready(prepare_params(params))   # one-time folding / packing
    x1 = jax.random.randint(k1, (BATCH, SEQ), 0, VOCAB, dtype=jnp.int32)
    x2 = jax.random.randint(k2, (BATCH, SEQ), 0, VOCAB, dtype=jnp.int32)

    out = jax.block_until_ready(cnn_forward(x1, x2, slab))
    ref = ref_forward(x1, x2, params)

    assert out.shape == (BATCH, NUM_CLASSES), out.shape
    assert jnp.allclose(out, ref, atol=2e-3, rtol=2e-3), (out, ref)
    print("KERNEL_OK")
</pallas_src>

<mosaic_0001>
module attributes {stable_mosaic.version = 11 : i64} {
  func.func @cnn_kernel(%arg0: memref<64x3xi32, #tpu.memory_space<vmem>>, %arg1: memref<224x128xf32, #tpu.memory_space<vmem>>, %arg2: memref<6x1xf32, #tpu.memory_space<vmem>>) attributes {dimension_semantics = [], scalar_prefetch = 0 : i64, scratch_operands = 0 : i64, tpu.core_type = #tpu.core_type<tc>} {
    %c0 = arith.constant 0 : index
    %c0_0 = arith.constant 0 : index
    %0 = vector.load %arg0[%c0, %c0_0] : memref<64x3xi32, #tpu.memory_space<vmem>>, vector<64x3xi32>
    %1 = tpu.iota {dimensions = array<i32: 1>} : vector<64x128xi32>
    %c31_i32 = arith.constant 31 : i32
    %2 = vector.broadcast %c31_i32 : i32 to vector<64x128xi32>
    %3 = arith.andi %1, %2 : vector<64x128xi32>
    %c32_i32 = arith.constant 32 : i32
    %4 = vector.broadcast %c32_i32 : i32 to vector<64x128xi32>
    %5 = arith.cmpi slt, %1, %4 : vector<64x128xi32>
    %6 = vector.extract_strided_slice %0 {offsets = [0, 0], sizes = [64, 1], strides = [1, 1]} : vector<64x3xi32> to vector<64x1xi32>
    %c64_i32 = arith.constant 64 : i32
    %7 = vector.broadcast %c64_i32 : i32 to vector<64x128xi32>
    %8 = arith.cmpi slt, %1, %7 : vector<64x128xi32>
    %9 = vector.extract_strided_slice %0 {offsets = [0, 1], sizes = [64, 1], strides = [1, 1]} : vector<64x3xi32> to vector<64x1xi32>
    %c96_i32 = arith.constant 96 : i32
    %10 = vector.broadcast %c96_i32 : i32 to vector<64x128xi32>
    %11 = arith.cmpi slt, %1, %10 : vector<64x128xi32>
    %12 = vector.extract_strided_slice %0 {offsets = [0, 2], sizes = [64, 1], strides = [1, 1]} : vector<64x3xi32> to vector<64x1xi32>
    %c-1_i32 = arith.constant -1 : i32
    %13 = vector.shape_cast %12 : vector<64x1xi32> to vector<64x1xi32>
    %14 = vector.broadcast %13 : vector<64x1xi32> to vector<64x128xi32>
    %15 = vector.broadcast %c-1_i32 : i32 to vector<64x128xi32>
    %16 = arith.select %11, %14, %15 : vector<64x128xi1>, vector<64x128xi32>
    %17 = vector.shape_cast %9 : vector<64x1xi32> to vector<64x1xi32>
    %18 = vector.broadcast %17 : vector<64x1xi32> to vector<64x128xi32>
    %19 = arith.select %8, %18, %16 : vector<64x128xi1>, vector<64x128xi32>
    %20 = vector.shape_cast %6 : vector<64x1xi32> to vector<64x1xi32>
    %21 = vector.broadcast %20 : vector<64x1xi32> to vector<64x128xi32>
    %22 = arith.select %5, %21, %19 : vector<64x128xi1>, vector<64x128xi32>
    %23 = arith.cmpi eq, %22, %3 : vector<64x128xi32>
    %24 = arith.extui %23 : vector<64x128xi1> to vector<64x128xi32>
    %25 = arith.sitofp %24 : vector<64x128xi32> to vector<64x128xf32>
    %c0_1 = arith.constant 0 : index
    %c0_2 = arith.constant 0 : index
    %26 = vector.load %arg1[%c0_1, %c0_2] : memref<224x128xf32, #tpu.memory_space<vmem>>, vector<128x32xf32>
    %cst = arith.constant dense<0.000000e+00> : vector<64x32xf32>
    %27 = tpu.matmul %25, %26, %cst {dimension_numbers = #tpu.dot_dimension_numbers<[1], [0], [0], [1], [0, 0, 1, 1], [], []>} : vector<64x128xf32>, vector<128x32xf32>, vector<64x32xf32> -> vector<64x32xf32>
    %c184 = arith.constant 184 : index
    %c0_3 = arith.constant 0 : index
    %28 = vector.load %arg1[%c184, %c0_3] : memref<224x128xf32, #tpu.memory_space<vmem>>, vector<1x32xf32>
    %29 = vector.broadcast %28 : vector<1x32xf32> to vector<64x32xf32>
    %30 = arith.addf %27, %29 : vector<64x32xf32>
    %cst_4 = arith.constant 0.000000e+00 : f32
    %31 = vector.broadcast %cst_4 : f32 to vector<64x32xf32>
    %32 = arith.maximumf %30, %31 : vector<64x32xf32>
    %c128 = arith.constant 128 : index
    %c0_5 = arith.constant 0 : index
    %33 = vector.load %arg1[%c128, %c0_5] : memref<224x128xf32, #tpu.memory_space<vmem>>, vector<32x16xf32>
    %cst_6 = arith.constant dense<0.000000e+00> : vector<64x16xf32>
    %34 = tpu.matmul %32, %33, %cst_6 {dimension_numbers = #tpu.dot_dimension_numbers<[1], [0], [0], [1], [0, 0, 1, 1], [], []>} : vector<64x32xf32>, vector<32x16xf32>, vector<64x16xf32> -> vector<64x16xf32>
    %c192 = arith.constant 192 : index
    %c0_7 = arith.constant 0 : index
    %35 = vector.load %arg1[%c192, %c0_7] : memref<224x128xf32, #tpu.memory_space<vmem>>, vector<1x16xf32>
    %36 = vector.broadcast %35 : vector<1x16xf32> to vector<64x16xf32>
    %37 = arith.addf %34, %36 : vector<64x16xf32>
    %cst_8 = arith.constant 0.000000e+00 : f32
    %38 = vector.broadcast %cst_8 : f32 to vector<64x16xf32>
    %39 = arith.maximumf %37, %38 : vector<64x16xf32>
    %cst_9 = arith.constant dense<0xFF800000> : vector<64xf32>
    %40 = vector.multi_reduction <maximumf>, %39, %cst_9 [1] : vector<64x16xf32> to vector<64xf32>
    %41 = vector.shape_cast %40 : vector<64xf32> to vector<64x1xf32>
    %c160 = arith.constant 160 : index
    %c0_10 = arith.constant 0 : index
    %42 = vector.load %arg1[%c160, %c0_10] : memref<224x128xf32, #tpu.memory_space<vmem>>, vector<16x64xf32>
    %cst_11 = arith.constant dense<0.000000e+00> : vector<16x1xf32>
    %43 = tpu.matmul %42, %41, %cst_11 {dimension_numbers = #tpu.dot_dimension_numbers<[1], [0], [0], [1], [0, 0, 1, 1], [], []>} : vector<16x64xf32>, vector<64x1xf32>, vector<16x1xf32> -> vector<16x1xf32>
    %c200 = arith.constant 200 : index
    %c0_12 = arith.constant 0 : index
    %44 = vector.load %arg1[%c200, %c0_12] : memref<224x128xf32, #tpu.memory_space<vmem>>, vector<16x1xf32>
    %45 = arith.addf %43, %44 : vector<16x1xf32>
    %cst_13 = arith.constant 0.000000e+00 : f32
    %46 = vector.broadcast %cst_13 : f32 to vector<16x1xf32>
    %47 = arith.maximumf %45, %46 : vector<16x1xf32>
    %c176 = arith.constant 176 : index
    %c0_14 = arith.constant 0 : index
    %48 = vector.load %arg1[%c176, %c0_14] : memref<224x128xf32, #tpu.memory_space<vmem>>, vector<6x16xf32>
    %cst_15 = arith.constant dense<0.000000e+00> : vector<6x1xf32>
    %49 = tpu.matmul %48, %47, %cst_15 {dimension_numbers = #tpu.dot_dimension_numbers<[1], [0], [0], [1], [0, 0, 1, 1], [], []>} : vector<6x16xf32>, vector<16x1xf32>, vector<6x1xf32> -> vector<6x1xf32>
    %c216 = arith.constant 216 : index
    %c0_16 = arith.constant 0 : index
    %50 = vector.load %arg1[%c216, %c0_16] : memref<224x128xf32, #tpu.memory_space<vmem>>, vector<6x1xf32>
    %51 = arith.addf %49, %50 : vector<6x1xf32>
    %52 = tpu.iota {dimensions = array<i32: 0>} : vector<6x1xi32>
    %c3_i32 = arith.constant 3 : i32
    %53 = vector.broadcast %c3_i32 : i32 to vector<6x1xi32>
    %54 = arith.cmpi slt, %52, %53 : vector<6x1xi32>
    %cst_17 = arith.constant -1.000000e+30 : f32
    %55 = vector.broadcast %cst_17 : f32 to vector<6x1xf32>
    %56 = arith.select %54, %51, %55 : vector<6x1xi1>, vector<6x1xf32>
    %cst_18 = arith.constant dense<0xFF800000> : vector<1xf32>
    %57 = vector.multi_reduction <maximumf>, %56, %cst_18 [0] : vector<6x1xf32> to vector<1xf32>
    %58 = vector.shape_cast %57 : vector<1xf32> to vector<1x1xf32>
    %cst_19 = arith.constant -1.000000e+30 : f32
    %59 = vector.broadcast %cst_19 : f32 to vector<6x1xf32>
    %60 = arith.select %54, %59, %51 : vector<6x1xi1>, vector<6x1xf32>
    %cst_20 = arith.constant dense<0xFF800000> : vector<1xf32>
    %61 = vector.multi_reduction <maximumf>, %60, %cst_20 [0] : vector<6x1xf32> to vector<1xf32>
    %62 = vector.shape_cast %61 : vector<1xf32> to vector<1x1xf32>
    %63 = vector.shape_cast %58 : vector<1x1xf32> to vector<1x1xf32>
    %64 = vector.broadcast %63 : vector<1x1xf32> to vector<6x1xf32>
    %65 = vector.shape_cast %62 : vector<1x1xf32> to vector<1x1xf32>
    %66 = vector.broadcast %65 : vector<1x1xf32> to vector<6x1xf32>
    %67 = arith.select %54, %64, %66 : vector<6x1xi1>, vector<6x1xf32>
    %68 = arith.subf %51, %67 : vector<6x1xf32>
    %69 = math.exp %68 : vector<6x1xf32>
    %cst_21 = arith.constant 0.000000e+00 : f32
    %70 = vector.broadcast %cst_21 : f32 to vector<6x1xf32>
    %71 = arith.select %54, %69, %70 : vector<6x1xi1>, vector<6x1xf32>
    %cst_22 = arith.constant dense<0.000000e+00> : vector<1xf32>
    %72 = vector.multi_reduction <add>, %71, %cst_22 [0] : vector<6x1xf32> to vector<1xf32>
    %73 = vector.shape_cast %72 : vector<1xf32> to vector<1x1xf32>
    %cst_23 = arith.constant 0.000000e+00 : f32
    %74 = vector.broadcast %cst_23 : f32 to vector<6x1xf32>
    %75 = arith.select %54, %74, %69 : vector<6x1xi1>, vector<6x1xf32>
    %cst_24 = arith.constant dense<0.000000e+00> : vector<1xf32>
    %76 = vector.multi_reduction <add>, %75, %cst_24 [0] : vector<6x1xf32> to vector<1xf32>
    %77 = vector.shape_cast %76 : vector<1xf32> to vector<1x1xf32>
    %78 = vector.shape_cast %73 : vector<1x1xf32> to vector<1x1xf32>
    %79 = vector.broadcast %78 : vector<1x1xf32> to vector<6x1xf32>
    %80 = vector.shape_cast %77 : vector<1x1xf32> to vector<1x1xf32>
    %81 = vector.broadcast %80 : vector<1x1xf32> to vector<6x1xf32>
    %82 = arith.select %54, %79, %81 : vector<6x1xi1>, vector<6x1xf32>
    %83 = arith.divf %69, %82 : vector<6x1xf32>
    %c0_25 = arith.constant 0 : index
    %c0_26 = arith.constant 0 : index
    %84 = vector.load %arg2[%c0_25, %c0_26] : memref<6x1xf32, #tpu.memory_space<vmem>>, vector<6x1xf32>
    tpu.vector_store %arg2[%c0_25, %c0_26], %83 {strides = array<i32>} : memref<6x1xf32, #tpu.memory_space<vmem>>, vector<6x1xf32>,
    return
  }
}

</mosaic_0001>

<bundles_post_ra>
// kernel: cnn_forward.1
= control target key start
LH: loop header
LB: loop body
LE: loop exit
PB: predicated region body
PF: predicated region fallthrough
CT: control target
= control target key end

     0   :  { %7 = vsyncpa [#allocation3], 0  ;;  %s955_s9 = smov [#allocation2]   ;;  %s1113_s0 = inlined_call_operand.vmem [shape: s32[64,3], index: 0, kind: input, shape index: {}]   ;;  %s1114_s1 = inlined_call_operand.hbm [shape: f32[224,128], index: 1, kind: input, shape index: {}]   ;;  %s1115_s2 = inlined_call_operand.vmem [shape: f32[6,1], index: 2, kind: output, shape index: {}]  }
   0x1   :  { %s15_s10 = sshll.u32 %s955_s9, 4  ;;  %s931_s13 = scalar_lea.hbm %s1114_s1, 3584  ;;  %s16_s10 = int_to_ptr.vmem [resolvable:$true] %s15_s10 }
   0x2   :  { %p932_p0 = scmp.ne.s32.totalorder %s1114_s1, %s931_s13  ;;  %p935_p1 = scmp.lt.u32.totalorder %s931_s13, %s1114_s1 }
   0x4   :  { %p937_p2 = pnand %p935_p1, %p932_p0 }
   0x6   :  { %940 = shalt.err (!%p937_p2)
}
   0x7   :  { %s941_s18 = scalar_lea.vmem %s16_s10, 3584  ;;  %p946_p4 = scmp.lt.s32.totalorder %s16_s10, %s16_s10 }
   0x8   :  { %p942_p3 = scmp.ne.s32.totalorder %s16_s10, %s941_s18  ;;  %p947_p5 = scmp.lt.s32.totalorder %s941_s18, %s941_s18 }
   0xa   :  { %p948_p6 = por %p947_p5, %p946_p4 }
   0xc   :  { %p949_p7 = pnand %p948_p6, %p942_p3 }
   0xe   :  { %952 = shalt.err (!%p949_p7)
}
   0xf   :  { %s956_s19 = smov 128   ;;  %s957_s20 = smov 8  }
  0x10   :  { %21 = dma.hbm_to_vmem [thread:$0]  %s1114_s1, 3584, %s16_s10, [#allocation3], %s956_s19, %s956_s19, %s957_s20  }
  0x11   :  { %953 = dma.done.wait [#allocation3], 3584  }
  0x12   :  { %954 = vsyncadd [#allocation3], 4294963712  ;;  %v958_v0 = vmov 1   ;;  %v959_v1 = vmov 2   ;;  %v25_v2 = vld [vmem:[%s1113_s0] sm:$0xff]  ;;  %v26_v3 = vld [vmem:[%s1113_s0 + $0x8] sm:$0xff]  ;;  %v33_v42 = vlaneseq }
  0x13   :  { %915 = vset.pattern.permute.xlu1 %v958_v0  ;;  %914 = vset.pattern.permute.xlu0 %v959_v1  ;;  %v159_v4 = vld [vmem:[#allocation2] sm:$0xff]  ;;  %v160_v5 = vld [vmem:[#allocation2 + $0x8] sm:$0xff]  ;;  %v161_v6 = vld [vmem:[#allocation2 + $0x10] sm:$0xff]  ;;  %v960_v14 = vmov 0   ;;  %v961_v60 = vmov 1.0   ;;  %vm302_vm11 = vcmask 261120  }
  0x14   :  { %72 = vperm.xlu1 %915, %v25_v2   ;;  %40 = vperm.xlu0 %914, %v25_v2   ;;  %v162_v7 = vld [vmem:[#allocation2 + $0x18] sm:$0xff]  ;;  %v845_v8 = vpack.c.bf16 %v160_v5, %v159_v4  ;;  %v163_v10 = vld [vmem:[#allocation2 + $0x20] sm:$0xff]  ;;  %v164_v11 = vld [vmem:[#allocation2 + $0x28] sm:$0xff]  ;;  %v1025_v45 = vand.u32 127, %v33_v42  ;;  %vm440_vm12 = vcmask 130048   ;;  %vm469_vm13 = vcmask 523264  }
  0x15   :  { %v849_v9 = vpack.c.bf16 %v162_v7, %v161_v6  ;;  %v28_v12 = vld [vmem:[%s1113_s0 + $0x18] sm:$0xff]  ;;  %v853_v13 = vpack.c.bf16 %v164_v11, %v163_v10  ;;  %v165_v15 = vld [vmem:[#allocation2 + $0x30] sm:$0xff]  ;;  %v30_v17 = vld [vmem:[%s1113_s0 + $0x28] sm:$0xff]  ;;  %vm963_vm14 = vmmov 0  }
  0x16   :  { %846 = vmatprep.subr.bf16.mxu0 %v845_v8  ;;  %v166_v16 = vld [vmem:[#allocation2 + $0x38] sm:$0xff]  ;;  %v27_v18 = vld [vmem:[%s1113_s0 + $0x10] sm:$0xff]  ;;  %v167_v20 = vld [vmem:[#allocation2 + $0x40] sm:$0xff]  ;;  %vm38_vm0 = vcmp.lt.s32.totalorder %v1025_v45, 96  ;;  %vm37_vm1 = vcmp.lt.s32.totalorder %v1025_v45, 64  ;;  %vm36_vm2 = vcmp.lt.s32.totalorder %v1025_v45, 32 }
  0x17   :  { %848 = vmatpush3.bf16.msra.mxu0 %v845_v8  ;;  %v857_v19 = vpack.c.bf16 %v166_v16, %v165_v15  ;;  %v168_v21 = vld [vmem:[#allocation2 + $0x48] sm:$0xff]  ;;  %v32_v22 = vld [vmem:[%s1113_s0 + $0x38] sm:$0xff]  ;;  %v169_v24 = vld [vmem:[#allocation2 + $0x50] sm:$0xff]  ;;  %v35_v52 = vand.u32 31, %v1025_v45 }
  0x18   :  { %75 = vperm.xlu1 %915, %v26_v3   ;;  %43 = vperm.xlu0 %914, %v26_v3   ;;  %v861_v23 = vpack.c.bf16 %v168_v21, %v167_v20  ;;  %v170_v25 = vld [vmem:[#allocation2 + $0x58] sm:$0xff]  ;;  %v171_v27 = vld [vmem:[#allocation2 + $0x60] sm:$0xff]  ;;  %v172_v28 = vld [vmem:[#allocation2 + $0x68] sm:$0xff] }
  0x19   :  { %850 = vmatprep.subr.bf16.mxu0 %v849_v9  ;;  %v865_v26 = vpack.c.bf16 %v170_v25, %v169_v24  ;;  %v869_v29 = vpack.c.bf16 %v172_v28, %v171_v27  ;;  %v173_v30 = vld [vmem:[#allocation2 + $0x70] sm:$0xff]  ;;  %v174_v31 = vld [vmem:[#allocation2 + $0x78] sm:$0xff]  ;;  %v29_v33 = vld [vmem:[%s1113_s0 + $0x20] sm:$0xff] }
  0x1a   :  { %v873_v32 = vpack.c.bf16 %v174_v31, %v173_v30  ;;  %v31_v34 = vld [vmem:[%s1113_s0 + $0x30] sm:$0xff]  ;;  %v293_v35 = vld [vmem:[#allocation2 + $0x80] sm:$0xff]  ;;  %v294_v36 = vld [vmem:[#allocation2 + $0x88] sm:$0xff] }
  0x1b   :  { %852 = vmatpush3.bf16.msra.mxu0 %v849_v9  ;;  %v877_v37 = vpack.c.bf16 %v294_v36, %v293_v35  ;;  %v296_v27 = vld [vmem:[#allocation2 + $0x98] sm:$0xff] }
  0x1c   :  { %916 = vset.pattern.permute.xlu1 %v960_v14  ;;  %49 = vperm.xlu0 %914, %v28_v12  }
  0x1d   :  { %107 = vperm.xlu1 %916, %v26_v3   ;;  %854 = vmatprep.subr.bf16.mxu0 %v853_v13 }
  0x1e   :  { %878 = vmatprep.subr.bf16.mxu1 %v877_v37 }
  0x1f   :  { %856 = vmatpush3.bf16.msra.mxu0 %v853_v13  ;;  %880 = vmatpush3.bf16.msra.mxu1 %v877_v37 }
  0x20   :  { %55 = vperm.xlu0 %914, %v30_v17   ;;  %858 = vmatprep.subr.bf16.mxu0 %v857_v19 }
  0x21   :  { %917 = vset.pattern.permute.xlu1 %v959_v1 }
  0x22   :  { %46 = vperm.xlu1 %917, %v27_v18  }
  0x23   :  { %860 = vmatpush3.bf16.msra.mxu0 %v857_v19 }
  0x24   :  { %61 = vperm.xlu0 %914, %v32_v22   ;;  %862 = vmatprep.subr.bf16.mxu0 %v861_v23 }
  0x26   :  { %918 = vset.pattern.permute.xlu1 %v958_v0 }
  0x27   :  { %78 = vperm.xlu1 %918, %v27_v18   ;;  %864 = vmatpush3.bf16.msra.mxu0 %v861_v23 }
  0x28   :  { %924 = vset.pattern.permute.xlu0 %v960_v14  ;;  %866 = vmatprep.subr.bf16.mxu0 %v865_v26 }
  0x29   :  { %104 = vperm.xlu0 %924, %v25_v2  }
  0x2b   :  { %81 = vperm.xlu1 %918, %v28_v12   ;;  %868 = vmatpush3.bf16.msra.mxu0 %v865_v26  ;;  %v295_v26 = vld [vmem:[#allocation2 + $0x90] sm:$0xff] }
  0x2c   :  { %870 = vmatprep.subr.bf16.mxu0 %v869_v29  ;;  %v881_v28 = vpack.c.bf16 %v296_v27, %v295_v26 }
  0x2d   :  { %110 = vperm.xlu0 %924, %v27_v18  }
  0x2e   :  { %882 = vmatprep.subr.bf16.mxu1 %v881_v28 }
  0x2f   :  { %919 = vset.pattern.permute.xlu1 %v960_v14  ;;  %872 = vmatpush3.bf16.msra.mxu0 %v869_v29  ;;  %v685_v29 = vld [vmem:[#allocation2 + $0xb8] ss:$0 sm:$0xff] }
  0x30   :  { %113 = vperm.xlu1 %919, %v28_v12   ;;  %874 = vmatprep.subr.bf16.mxu0 %v873_v32 }
  0x31   :  { %116 = vperm.xlu0 %924, %v29_v33   ;;  %884 = vmatpush3.bf16.msra.mxu1 %v881_v28 }
  0x33   :  { %876 = vmatpush3.bf16.msra.mxu0 %v873_v32 }
  0x34   :  { %920 = vset.pattern.permute.xlu1 %v959_v1 }
  0x35   :  { %52 = vperm.xlu1 %920, %v29_v33   ;;  %122 = vperm.xlu0 %924, %v31_v34  }
  0x39   :  { %921 = vset.pattern.permute.xlu1 %v958_v0 }
  0x3a   :  { %84 = vperm.xlu1 %921, %v29_v33  }
  0x3e   :  { %87 = vperm.xlu1 %921, %v30_v17  }
  0x42   :  { %922 = vset.pattern.permute.xlu1 %v960_v14 }
  0x43   :  { %119 = vperm.xlu1 %922, %v30_v17  }
  0x47   :  { %923 = vset.pattern.permute.xlu1 %v959_v1 }
  0x48   :  { %58 = vperm.xlu1 %923, %v31_v34  }
  0x4c   :  { %925 = vset.pattern.permute.xlu1 %v958_v0 }
  0x4d   :  { %90 = vperm.xlu1 %925, %v31_v34  }
  0x51   :  { %93 = vperm.xlu1 %925, %v32_v22  }
  0x55   :  { %926 = vset.pattern.permute.xlu1 %v960_v14 }
  0x56   :  { %125 = vperm.xlu1 %926, %v32_v22  }
  0x93   :  { %v73_v38 = vpop.permute.xlu1 %72  ;;  %v41_v39 = vpop.permute.xlu0 %40 }
  0x94   :  { %v63_v50 = vsel %vm38_vm0, %v41_v39, 4294967295 }
  0x95   :  { %v95_v54 = vsel %vm37_vm1, %v73_v38, %v63_v50 }
  0x97   :  { %v76_v40 = vpop.permute.xlu1 %75  ;;  %v44_v41 = vpop.permute.xlu0 %43 }
  0x98   :  { %v64_v49 = vsel %vm38_vm0, %v44_v41, 4294967295 }
  0x99   :  { %v96_v53 = vsel %vm37_vm1, %v76_v40, %v64_v49 }
  0x9b   :  { %v50_v43 = vpop.permute.xlu0 %49 }
  0x9c   :  { %v108_v44 = vpop.permute.xlu1 %107  ;;  %v66_v61 = vsel %vm38_vm0, %v50_v43, 4294967295 }
  0x9d   :  { %v128_v55 = vsel %vm36_vm2, %v108_v44, %v96_v53 }
  0x9e   :  { %vm136_vm4 = vcmp.eq.s32.totalorder %v128_v55, %v35_v52  ;;  %v694_v55 = vld [vmem:[#allocation2 + $0xc0] ss:$0 sm:$0xff] }
  0x9f   :  { %v56_v46 = vpop.permute.xlu0 %55 }
  0xa0   :  { %v68_v11 = vsel %vm38_vm0, %v56_v46, 4294967295 }
  0xa1   :  { %v47_v47 = vpop.permute.xlu1 %46 }
  0xa2   :  { %v65_v59 = vsel %vm38_vm0, %v47_v47, 4294967295 }
  0xa3   :  { %v62_v48 = vpop.permute.xlu0 %61 }
  0xa4   :  { %v70_v22 = vsel %vm38_vm0, %v62_v48, 4294967295 }
  0xa6   :  { %v79_v51 = vpop.permute.xlu1 %78 }
  0xa7   :  { %v97_v62 = vsel %vm37_vm1, %v79_v51, %v65_v59 }
  0xa8   :  { %v105_v56 = vpop.permute.xlu0 %104 }
  0xa9   :  { %v127_v57 = vsel %vm36_vm2, %v105_v56, %v95_v54 }
  0xaa   :  { %v82_v58 = vpop.permute.xlu1 %81  ;;  %vm135_vm3 = vcmp.eq.s32.totalorder %v127_v57, %v35_v52 }
  0xab   :  { %787 = vmatprep.mubr.msk.f32.mxu0 %vm135_vm3, %v961_v60  ;;  %v98_v1 = vsel %vm37_vm1, %v82_v58, %v66_v61 }
  0xac   :  { %788 = vmatmul.mubr.msk.f32.vlgmr.msra.gmra.mrb[0].mxu0 %vm136_vm4, %v961_v60  ;;  %v111_v63 = vpop.permute.xlu0 %110 }
  0xad   :  { %v129_v0 = vsel %vm36_vm2, %v111_v63, %v97_v62 }
  0xae   :  { %vm137_vm5 = vcmp.eq.s32.totalorder %v129_v0, %v35_v52 }
  0xaf   :  { %v114_v2 = vpop.permute.xlu1 %113  ;;  %790 = vmatprep.mubr.msk.f32.mxu0 %vm137_vm5, %v961_v60 }
  0xb0   :  { %v130_v3 = vsel %vm36_vm2, %v114_v2, %v98_v1  ;;  %v117_v5 = vpop.permute.xlu0 %116 }
  0xb1   :  { %vm138_vm6 = vcmp.eq.s32.totalorder %v130_v3, %v35_v52 }
  0xb2   :  { %791 = vmatmul.mubr.msk.f32.gmra.mrb[2].mxu0 %vm138_vm6, %v961_v60 }
  0xb4   :  { %v53_v4 = vpop.permute.xlu1 %52  ;;  %v123_v18 = vpop.permute.xlu0 %122 }
  0xb5   :  { %v67_v6 = vsel %vm38_vm0, %v53_v4, 4294967295 }
  0xb9   :  { %v85_v7 = vpop.permute.xlu1 %84 }
  0xba   :  { %v99_v8 = vsel %vm37_vm1, %v85_v7, %v67_v6 }
  0xbb   :  { %v131_v9 = vsel %vm36_vm2, %v117_v5, %v99_v8 }
  0xbc   :  { %vm139_vm7 = vcmp.eq.s32.totalorder %v131_v9, %v35_v52 }
  0xbd   :  { %v88_v10 = vpop.permute.xlu1 %87  ;;  %793 = vmatprep.mubr.msk.f32.mxu0 %vm139_vm7, %v961_v60 }
  0xbe   :  { %v100_v12 = vsel %vm37_vm1, %v88_v10, %v68_v11 }
  0xc2   :  { %v120_v13 = vpop.permute.xlu1 %119 }
  0xc3   :  { %v132_v14 = vsel %vm36_vm2, %v120_v13, %v100_v12 }
  0xc4   :  { %vm140_vm8 = vcmp.eq.s32.totalorder %v132_v14, %v35_v52 }
  0xc5   :  { %794 = vmatmul.mubr.msk.f32.gmra.mrb[4].mxu0 %vm140_vm8, %v961_v60 }
  0xc7   :  { %v59_v15 = vpop.permute.xlu1 %58 }
  0xc8   :  { %v69_v16 = vsel %vm38_vm0, %v59_v15, 4294967295  ;;  %vm632_vm0 = vcmask 5120  }
  0xcc   :  { %v91_v17 = vpop.permute.xlu1 %90 }
  0xcd   :  { %v101_v19 = vsel %vm37_vm1, %v91_v17, %v69_v16 }
  0xce   :  { %v133_v20 = vsel %vm36_vm2, %v123_v18, %v101_v19 }
  0xcf   :  { %vm141_vm9 = vcmp.eq.s32.totalorder %v133_v20, %v35_v52 }
  0xd0   :  { %v94_v21 = vpop.permute.xlu1 %93  ;;  %796 = vmatprep.mubr.msk.f32.mxu0 %vm141_vm9, %v961_v60 }
  0xd1   :  { %v102_v23 = vsel %vm37_vm1, %v94_v21, %v70_v22 }
  0xd5   :  { %v126_v24 = vpop.permute.xlu1 %125 }
  0xd6   :  { %v134_v25 = vsel %vm36_vm2, %v126_v24, %v102_v23  ;;  %v465_v24 = vld [vmem:[#allocation2 + $0xa0] sm:$0xff] }
  0xd7   :  { %vm142_vm10 = vcmp.eq.s32.totalorder %v134_v25, %v35_v52 }
  0xd8   :  { %797 = vmatmul.mubr.msk.f32.gmra.mrb[6].mxu0 %vm142_vm10, %v961_v60 }
 0x17f   :  { %v789_v30 = vpop.f32.mrb[0].mxu0 }
 0x180   :  { %v252_v31 = vadd.f32 %v789_v30, %v685_v29  ;;  %v246_v32 = vpop.f32.mrb[1].mxu0 }
 0x181   :  { %v247_v33 = vadd.f32 %v685_v29, %v246_v32 }
 0x182   :  { %v286_v35 = vmax.f32 %v252_v31, 0.0 }
 0x183   :  { %v285_v34 = vmax.f32 %v247_v33, 0.0 }
 0x185   :  { %v792_v36 = vpop.f32.mrb[2].mxu0  ;;  %807 = vmatprep.mubr.msk.f32.mxu1 %vm302_vm11, %v285_v34 }
 0x186   :  { %v262_v37 = vadd.f32 %v792_v36, %v685_v29  ;;  %v256_v38 = vpop.f32.mrb[3].mxu0  ;;  %808 = vmatmul.mubr.msk.f32.vlgmr.msra.gmra.mrb[0].mxu1 %vm302_vm11, %v286_v35 }
 0x187   :  { %v257_v39 = vadd.f32 %v685_v29, %v256_v38  ;;  %v962_v38 = vmov 0.0|0.0  }
 0x188   :  { %v288_v41 = vmax.f32 %v262_v37, 0.0  ;;  %v466_v37 = vld [vmem:[#allocation2 + $0xa8] sm:$0xff] }
 0x189   :  { %v287_v40 = vmax.f32 %v257_v39, 0.0  ;;  %v964_v39 = vmov 0.0  }
 0x18b   :  { %810 = vmatprep.mubr.msk.f32.mxu1 %vm302_vm11, %v287_v40  ;;  %v468_v40 = vld [vmem:[#allocation2 + $0xd0] sm:$0xff] }
 0x18c   :  { %811 = vmatmul.mubr.msk.f32.gmra.mrb[2].mxu1 %vm302_vm11, %v288_v41  ;;  %v467_v41 = vld [vmem:[#allocation2 + $0xc8] sm:$0xff] }
 0x198   :  { %v795_v43 = vpop.f32.mrb[4].mxu0 }
 0x199   :  { %v272_v44 = vadd.f32 %v795_v43, %v685_v29  ;;  %v266_v45 = vpop.f32.mrb[5].mxu0 }
 0x19a   :  { %v267_v46 = vadd.f32 %v685_v29, %v266_v45 }
 0x19b   :  { %v290_v48 = vmax.f32 %v272_v44, 0.0 }
 0x19c   :  { %v289_v47 = vmax.f32 %v267_v46, 0.0 }
 0x19e   :  { %813 = vmatprep.mubr.msk.f32.mxu1 %vm302_vm11, %v289_v47 }
 0x19f   :  { %814 = vmatmul.mubr.msk.f32.gmra.mrb[4].mxu1 %vm302_vm11, %v290_v48 }
 0x1ab   :  { %v798_v49 = vpop.f32.mrb[6].mxu0 }
 0x1ac   :  { %v282_v50 = vadd.f32 %v798_v49, %v685_v29  ;;  %v276_v51 = vpop.f32.mrb[7].mxu0 }
 0x1ad   :  { %v277_v52 = vadd.f32 %v685_v29, %v276_v51  ;;  %v629_v51 = vshrl.u32 %v33_v42, 7 }
 0x1ae   :  { %v292_v54 = vmax.f32 %v282_v50, 0.0  ;;  %v553_v50 = vld [vmem:[#allocation2 + $0xb0] sm:$0x3f] }
 0x1af   :  { %v291_v53 = vmax.f32 %v277_v52, 0.0  ;;  %v554_v52 = vld [vmem:[#allocation2 + $0xd8] sm:$0x3f]  ;;  %vm630_vm15 = vcmp.lt.s32.totalorder %v629_v51, 3 }
 0x1b1   :  { %816 = vmatprep.mubr.msk.f32.mxu1 %vm302_vm11, %v291_v53 }
 0x1b2   :  { %817 = vmatmul.mubr.msk.f32.gmra.mrb[6].mxu1 %vm302_vm11, %v292_v54 }
 0x1b3   :  { %835 = vmatprep.mubr.msk.f32.mxu1 %vm469_vm13, %v465_v24 }
 0x259   :  { %v809_v56 = vpop.f32.mrb[0].mxu1 }
 0x25a   :  { %v399_v57 = vadd.f32 %v809_v56, %v694_v55  ;;  %v393_v58 = vpop.f32.mrb[1].mxu1 }
 0x25b   :  { %v394_v59 = vadd.f32 %v694_v55, %v393_v58 }
 0x25c   :  { %v433_v60 = vmax.f32 %v399_v57, 0.0 }
 0x25d   :  { %v432_v61 = vmax.f32 %v394_v59, 0.0 }
 0x25e   :  { %v444_v62 = vsel %vm440_vm12, %v433_v60, -inf }
 0x25f   :  { %445 = vmax.xlane.f32.xlu0 %v444_v62  ;;  %v812_v63 = vpop.f32.mrb[2].mxu1  ;;  %v441_v0 = vsel %vm440_vm12, %v432_v61, -inf }
 0x260   :  { %v409_v1 = vadd.f32 %v812_v63, %v694_v55  ;;  %442 = vmax.xlane.f32.xlu1 %v441_v0  ;;  %v403_v2 = vpop.f32.mrb[3].mxu1 }
 0x261   :  { %v404_v3 = vadd.f32 %v694_v55, %v403_v2 }
 0x262   :  { %v435_v4 = vmax.f32 %v409_v1, 0.0 }
 0x263   :  { %v434_v5 = vmax.f32 %v404_v3, 0.0 }
 0x264   :  { %v450_v6 = vsel %vm440_vm12, %v435_v4, -inf }
 0x265   :  { %451 = vmax.xlane.f32.xlu1 %v450_v6  ;;  %v447_v7 = vsel %vm440_vm12, %v434_v5, -inf }
 0x266   :  { %448 = vmax.xlane.f32.xlu0 %v447_v7 }
 0x272   :  { %v815_v8 = vpop.f32.mrb[4].mxu1 }
 0x273   :  { %v419_v9 = vadd.f32 %v815_v8, %v694_v55  ;;  %v413_v10 = vpop.f32.mrb[5].mxu1 }
 0x274   :  { %v414_v11 = vadd.f32 %v694_v55, %v413_v10 }
 0x275   :  { %v437_v12 = vmax.f32 %v419_v9, 0.0 }
 0x276   :  { %v436_v13 = vmax.f32 %v414_v11, 0.0 }
 0x277   :  { %v456_v14 = vsel %vm440_vm12, %v437_v12, -inf }
 0x278   :  { %457 = vmax.xlane.f32.xlu1 %v456_v14  ;;  %v453_v15 = vsel %vm440_vm12, %v436_v13, -inf }
 0x279   :  { %454 = vmax.xlane.f32.xlu0 %v453_v15 }
 0x285   :  { %v818_v16 = vpop.f32.mrb[6].mxu1 }
 0x286   :  { %v429_v17 = vadd.f32 %v818_v16, %v694_v55  ;;  %v423_v18 = vpop.f32.mrb[7].mxu1 }
 0x287   :  { %v424_v19 = vadd.f32 %v694_v55, %v423_v18 }
 0x288   :  { %v439_v20 = vmax.f32 %v429_v17, 0.0 }
 0x289   :  { %v438_v21 = vmax.f32 %v424_v19, 0.0 }
 0x28a   :  { %v462_v22 = vsel %vm440_vm12, %v439_v20, -inf }
 0x28b   :  { %463 = vmax.xlane.f32.xlu1 %v462_v22  ;;  %v459_v23 = vsel %vm440_vm12, %v438_v21, -inf }
 0x28c   :  { %460 = vmax.xlane.f32.xlu0 %v459_v23 }
 0x2ec   :  { %v446_v25 = vpop.xlane.xlu0 %445 }
 0x2ed   :  { %v443_v26 = vpop.xlane.xlu1 %442 }
 0x2ee   :  { %v885_v27 = vpack.c.bf16 %v446_v25, %v443_v26 }
 0x2f0   :  { %886 = vmatprep.subr.bf16.mxu1 %v885_v27 }
 0x2f1   :  { %888 = vmatpush3.bf16.msra.mxu1 %v885_v27 }
 0x2f2   :  { %v452_v28 = vpop.xlane.xlu1 %451 }
 0x2f3   :  { %v449_v29 = vpop.xlane.xlu0 %448 }
 0x2f4   :  { %v889_v30 = vpack.c.bf16 %v452_v28, %v449_v29 }
 0x2f6   :  { %890 = vmatprep.subr.bf16.mxu1 %v889_v30 }
 0x2f7   :  { %892 = vmatpush3.bf16.msra.mxu1 %v889_v30 }
 0x305   :  { %v458_v31 = vpop.xlane.xlu1 %457 }
 0x306   :  { %v455_v32 = vpop.xlane.xlu0 %454 }
 0x307   :  { %v893_v33 = vpack.c.bf16 %v458_v31, %v455_v32 }
 0x309   :  { %894 = vmatprep.subr.bf16.mxu1 %v893_v33 }
 0x30a   :  { %896 = vmatpush3.bf16.msra.mxu1 %v893_v33 }
 0x318   :  { %v464_v34 = vpop.xlane.xlu1 %463 }
 0x319   :  { %v461_v35 = vpop.xlane.xlu0 %460 }
 0x31a   :  { %v897_v36 = vpack.c.bf16 %v464_v34, %v461_v35 }
 0x31c   :  { %898 = vmatprep.subr.bf16.mxu1 %v897_v36 }
 0x31d   :  { %900 = vmatpush3.bf16.msra.mxu1 %v897_v36 }
 0x31e   :  { %901 = vmatprep.subr.bf16.mxu1 %v962_v38 }
 0x320   :  { %836 = vmatmul.mubr.msk.f32.vlgmr.msra.gmra.mrb[8].mxu1 %vm469_vm13, %v466_v37 }
 0x321   :  { %842 = vmatprep.mubr.msk.f32.mxu1 %vm963_vm14, %v964_v39 }
 0x3f3   :  { %v837_v43 = vpop.f32.mrb[8].mxu1 }
 0x3f4   :  { %v548_v44 = vadd.f32 %v837_v43, %v468_v40  ;;  %v542_v45 = vpop.f32.mrb[9].mxu1 }
 0x3f5   :  { %v543_v46 = vadd.f32 %v542_v45, %v467_v41 }
 0x3f6   :  { %v552_v47 = vmax.f32 %v548_v44, 0.0 }
 0x3f7   :  { %v551_v48 = vmax.f32 %v543_v46, 0.0 }
 0x3f9   :  { %v902_v49 = vpack.c.bf16 %v552_v47, %v551_v48 }
 0x3fb   :  { %903 = vmatpush3.bf16.msra.mxu1 %v902_v49 }
 0x3fe   :  { %843 = vmatmul.mubr.msk.f32.vlgmr.msra.gmra.mrb[10].mxu1 %vm440_vm12, %v553_v50 }
 0x4d1   :  { %v624_v53 = vpop.f32.mrb[10].mxu1 }
 0x4d2   :  { %v625_v54 = vadd.f32 %v624_v53, %v554_v52  ;;  %v844_v55 = vpop.f32.mrb[11].mxu1 }
 0x4d4   :  { %v631_v56 = vsel %vm630_vm15, %v625_v54, -1e+30  ;;  %v640_v57 = vsel %vm630_vm15, -1e+30, %v625_v54 }
 0x4d5   :  { %v633_v58 = vsel %vm632_vm0, %v631_v56, -inf  ;;  %v641_v59 = vsel %vm632_vm0, %v640_v57, -inf }
 0x4d6   :  { %v634_v60 = vrot.slane %v633_v58, 4  ;;  %v642_v61 = vrot.slane %v641_v59, 4 }
 0x4d8   :  { %v635_v62 = vmax.f32 %v633_v58, %v634_v60  ;;  %v643_v63 = vmax.f32 %v641_v59, %v642_v61 }
 0x4da   :  { %v636_v0 = vrot.slane %v635_v62, 2  ;;  %v644_v42 = vrot.slane %v643_v63, 2 }
 0x4dc   :  { %v637_v1 = vmax.f32 %v635_v62, %v636_v0  ;;  %v645_v2 = vmax.f32 %v643_v63, %v644_v42 }
 0x4de   :  { %v638_v3 = vrot.slane %v637_v1, 1  ;;  %v646_v4 = vrot.slane %v645_v2, 1 }
 0x4e0   :  { %v639_v5 = vmax.f32 %v637_v1, %v638_v3  ;;  %v647_v6 = vmax.f32 %v645_v2, %v646_v4 }
 0x4e2   :  { %v648_v7 = vsel %vm630_vm15, %v639_v5, %v647_v6 }
 0x4e3   :  { %v649_v8 = vsub.f32 %v625_v54, %v648_v7 }
 0x4e5   :  { %v650_v9 = vmul.f32 1.442695, %v649_v8 }
 0x4e7   :  { %927 = vpow2.f32 %v650_v9 }
 0x4f1   :  { %v928_v10 = vpop.eup %927 }
 0x4f2   :  { %v652_v11 = vsel %vm630_vm15, %v928_v10, 0.0  ;;  %v660_v12 = vsel %vm630_vm15, 0.0, %v928_v10 }
 0x4f3   :  { %v653_v13 = vsel %vm632_vm0, %v652_v11, 0.0  ;;  %v661_v14 = vsel %vm632_vm0, %v660_v12, 0.0 }
 0x4f4   :  { %v654_v15 = vrot.slane %v653_v13, 4  ;;  %v662_v16 = vrot.slane %v661_v14, 4 }
 0x4f6   :  { %v655_v17 = vadd.f32 %v654_v15, %v653_v13  ;;  %v663_v18 = vadd.f32 %v662_v16, %v661_v14 }
 0x4f8   :  { %v656_v19 = vrot.slane %v655_v17, 2  ;;  %v664_v20 = vrot.slane %v663_v18, 2 }
 0x4fa   :  { %v657_v21 = vadd.f32 %v656_v19, %v655_v17  ;;  %v665_v22 = vadd.f32 %v664_v20, %v663_v18 }
 0x4fc   :  { %v658_v23 = vrot.slane %v657_v21, 1  ;;  %v666_v24 = vrot.slane %v665_v22, 1 }
 0x4fe   :  { %v659_v25 = vadd.f32 %v658_v23, %v657_v21  ;;  %v667_v26 = vadd.f32 %v666_v24, %v665_v22 }
 0x500   :  { %v668_v27 = vsel %vm630_vm15, %v659_v25, %v667_v26 }
 0x501   :  { %929 = vrcp.f32 %v668_v27 }
 0x50b   :  { %v930_v28 = vpop.eup %929 }
 0x50c   :  { %v670_v29 = vmul.f32 %v930_v28, %v928_v10 }
 0x50e   :  { %671 = vst.msk [vmem:[%s1115_s2] sm:$0x3f] %vm632_vm0, %v670_v29 }
 0x50f   :  { %676 = vsyncpa [#allocation3], 1 }

</bundles_post_ra>
